<compile_context>
chip_gen: v7x
topology: tpu7x:2x2x1
jax: 0.10.0
libtpu: 0.0.40
codegen_flags: <defaults>
</compile_context>

<pallas_src>
import jax
import jax.numpy as jnp
from jax.experimental import pallas as pl
from jax.experimental.pallas import tpu as pltpu

LEAKY_SLOPE = 0.01   # torch.nn.functional.leaky_relu default
NORM_EPS = 1e-12     # torch.nn.functional.normalize default eps
SUBLANE = 16         # multiple of 8 (f32) and 16 (bf16 sublane packing)


def _round_up(x, m):
    return ((x + m - 1) // m) * m


def gnn_fvec_kernel(x_ref, w1_ref, b1_ref, w2_ref, b2_ref, out_ref):
    # fc_fvec1: bf16 x bf16 -> f32 accumulate on the MXU.  [TB, F] @ [F, 128]
    h = jnp.dot(x_ref[...], w1_ref[...], preferred_element_type=jnp.float32)
    h = h + b1_ref[...].astype(jnp.float32)
    # leaky_relu in f32 (v5e VPU has no bf16 path).
    h = jnp.where(h > 0, h, LEAKY_SLOPE * h)
    # fc_fvec2: narrow back to bf16 only at the matmul-input boundary.
    y = jnp.dot(h.astype(jnp.bfloat16), w2_ref[...],
                preferred_element_type=jnp.float32)
    y = y + b2_ref[...].astype(jnp.float32)
    # L2 normalize rows: y * rsqrt(max(sum(y^2), eps^2)) == y / max(||y||, eps).
    sumsq = jnp.sum(y * y, axis=1, keepdims=True)
    inv = jax.lax.rsqrt(jnp.maximum(sumsq, NORM_EPS * NORM_EPS))
    out_ref[...] = (y * inv).astype(out_ref.dtype)


def _xla_forward_fvec(fvec, w1_t, b1, w2_t, b2):
    # Plain XLA reference (f32) — also used as the tiny-batch fast path.
    h = fvec @ w1_t + b1
    h = jnp.where(h > 0, h, LEAKY_SLOPE * h)
    y = h @ w2_t + b2
    norm = jnp.sqrt(jnp.sum(y * y, axis=1, keepdims=True))
    return y / jnp.maximum(norm, NORM_EPS)


def gnn_forward_fvec(fvec, w1_t, b1, w2_t, b2, *, tb=4096,
                     out_dtype=jnp.bfloat16, min_pallas_batch=128,
                     force_pallas=False):
    B, F = fvec.shape
    H = w2_t.shape[1]

    # Tiny-batch dispatch: launch + pipeline prologue dominate; let XLA fuse it.
    if not force_pallas and B < min_pallas_batch:
        return _xla_forward_fvec(fvec, w1_t, b1, w2_t, b2).astype(out_dtype)

    # bf16 streaming at the call boundary: halves the HBM DMA width for the
    # activations and weights; the kernel accumulates in f32.
    x = fvec.astype(jnp.bfloat16)
    w1 = w1_t.astype(jnp.bfloat16)
    w2 = w2_t.astype(jnp.bfloat16)
    bb1 = b1.astype(jnp.bfloat16)
    bb2 = b2.astype(jnp.bfloat16)

    # Batch tile: multiple of 16, capped at `tb`, and — when B is large enough —
    # chosen so the grid has >= 2 blocks so the "parallel" batch axis can shard
    # across both v7x TensorCores.  Pad B up to a tile multiple on the host;
    # padded rows are sliced off afterwards (row-wise normalize means they
    # cannot contaminate real rows).
    half = _round_up(pl.cdiv(B, 2), SUBLANE)
    tile_b = min(tb, max(SUBLANE, half), _round_up(B, SUBLANE))
    b_pad = _round_up(B, tile_b)
    if b_pad != B:
        x = jnp.pad(x, ((0, b_pad - B), (0, 0)))

    grid = (b_pad // tile_b,)
    out_itemsize = jnp.dtype(out_dtype).itemsize

    cost = pl.CostEstimate(
        flops=2 * b_pad * (F * H + H * H),
        transcendentals=b_pad,  # one rsqrt per row (advisory)
        bytes_accessed=(2 * (b_pad * F + F * H + H * H + 2 * H)   # bf16 inputs
                        + out_itemsize * b_pad * H),              # output
    )

    out = pl.pallas_call(
        gnn_fvec_kernel,
        out_shape=jax.ShapeDtypeStruct((b_pad, H), out_dtype),
        grid=grid,
        in_specs=[
            pl.BlockSpec((tile_b, F), lambda i: (i, 0)),   # fvec  [TB, F]   streamed
            pl.BlockSpec((F, H), lambda i: (0, 0)),        # W1^T  [F, 128]  resident
            pl.BlockSpec((1, H), lambda i: (0, 0)),        # b1    [1, 128]  resident
            pl.BlockSpec((H, H), lambda i: (0, 0)),        # W2^T  [128,128] resident
            pl.BlockSpec((1, H), lambda i: (0, 0)),        # b2    [1, 128]  resident
        ],
        out_specs=pl.BlockSpec((tile_b, H), lambda i: (i, 0)),
        compiler_params=pltpu.CompilerParams(
            dimension_semantics=("parallel",),
            vmem_limit_bytes=32 * 1024 * 1024,
        ),
        cost_estimate=cost,
    )(x, w1, bb1, w2, bb2)

    return out[:B]


if __name__ == "__main__":
    n_form_feats = 32
    hidden = 128

    key = jax.random.PRNGKey(0)
    k_x, k_w1, k_b1, k_w2, k_b2, k_x2 = jax.random.split(key, 6)

    # Deterministic parameter init (uniform, torch-Linear-like fan_in bound).
    bound1 = 1.0 / (n_form_feats ** 0.5)
    w1_t = jax.random.uniform(k_w1, (n_form_feats, hidden), jnp.float32,
                              -bound1, bound1)          # fc_fvec1.weight^T
    b1 = jax.random.uniform(k_b1, (1, hidden), jnp.float32, -bound1, bound1)

    bound2 = 1.0 / (hidden ** 0.5)
    w2_t = jax.random.uniform(k_w2, (hidden, hidden), jnp.float32,
                              -bound2, bound2)          # fc_fvec2.weight^T
    b2 = jax.random.uniform(k_b2, (1, hidden), jnp.float32, -bound2, bound2)

    # Case 1: tiny batch forced through the Pallas path (single small block).
    batch = 8
    fvec = jax.random.normal(k_x, (batch, n_form_feats), dtype=jnp.float32)
    out = jax.block_until_ready(
        gnn_forward_fvec(fvec, w1_t, b1, w2_t, b2, force_pallas=True))
    ref = _xla_forward_fvec(fvec, w1_t, b1, w2_t, b2)
    assert out.shape == (batch, hidden)
    assert jnp.allclose(out.astype(jnp.float32), ref, atol=2e-2), (
        float(jnp.max(jnp.abs(out.astype(jnp.float32) - ref))))

    # Case 2: larger, non-tile-multiple batch -> grid of 2 blocks (both v7x TCs),
    # host-side padding, bf16 streamed inputs + bf16 output.
    batch2 = 1000
    fvec2 = jax.random.normal(k_x2, (batch2, n_form_feats), dtype=jnp.float32)
    out2 = jax.block_until_ready(gnn_forward_fvec(fvec2, w1_t, b1, w2_t, b2))
    ref2 = _xla_forward_fvec(fvec2, w1_t, b1, w2_t, b2)
    assert out2.shape == (batch2, hidden)
    assert jnp.allclose(out2.astype(jnp.float32), ref2, atol=2e-2), (
        float(jnp.max(jnp.abs(out2.astype(jnp.float32) - ref2))))

    # Case 3: f32 output variant of the Pallas path (inputs still bf16-streamed).
    out3 = jax.block_until_ready(
        gnn_forward_fvec(fvec2, w1_t, b1, w2_t, b2, out_dtype=jnp.float32))
    assert out3.dtype == jnp.float32
    assert jnp.allclose(out3, ref2, atol=1e-2)

    # Case 4: default dispatch at tiny batch takes the fused XLA fallback.
    out4 = jax.block_until_ready(gnn_forward_fvec(fvec, w1_t, b1, w2_t, b2))
    assert jnp.allclose(out4.astype(jnp.float32), ref, atol=1e-2)

    print("KERNEL_OK")
</pallas_src>

<mosaic_0001>
module attributes {stable_mosaic.version = 11 : i64} {
  func.func @gnn_fvec_kernel(%arg0: i32, %arg1: memref<16x32xbf16, #tpu.memory_space<vmem>>, %arg2: memref<32x128xbf16, #tpu.memory_space<vmem>>, %arg3: memref<1x128xbf16, #tpu.memory_space<vmem>>, %arg4: memref<128x128xbf16, #tpu.memory_space<vmem>>, %arg5: memref<1x128xbf16, #tpu.memory_space<vmem>>, %arg6: memref<16x128xbf16, #tpu.memory_space<vmem>>) attributes {dimension_semantics = [#tpu.dimension_semantics<parallel>], iteration_bounds = array<i64: 1>, scalar_prefetch = 0 : i64, scratch_operands = 0 : i64, tpu.core_type = #tpu.core_type<tc>, window_params = [{transform_indices = @transform_0, window_bounds = array<i64: 16, 32>}, {pipeline_mode = #tpu.pipeline_mode<synchronous>, transform_indices = @transform_1, window_bounds = array<i64: 32, 128>}, {pipeline_mode = #tpu.pipeline_mode<synchronous>, transform_indices = @transform_2, window_bounds = array<i64: 1, 128>}, {pipeline_mode = #tpu.pipeline_mode<synchronous>, transform_indices = @transform_3, window_bounds = array<i64: 128, 128>}, {pipeline_mode = #tpu.pipeline_mode<synchronous>, transform_indices = @transform_4, window_bounds = array<i64: 1, 128>}, {transform_indices = @transform_5, window_bounds = array<i64: 16, 128>}]} {
    %c0 = arith.constant 0 : index
    %c0_0 = arith.constant 0 : index
    %0 = vector.load %arg1[%c0, %c0_0] : memref<16x32xbf16, #tpu.memory_space<vmem>>, vector<16x32xbf16>
    %c0_1 = arith.constant 0 : index
    %c0_2 = arith.constant 0 : index
    %1 = vector.load %arg2[%c0_1, %c0_2] : memref<32x128xbf16, #tpu.memory_space<vmem>>, vector<32x128xbf16>
    %cst = arith.constant dense<0.000000e+00> : vector<16x128xf32>
    %2 = tpu.matmul %0, %1, %cst {dimension_numbers = #tpu.dot_dimension_numbers<[1], [0], [0], [1], [0, 0, 1, 1], [], []>} : vector<16x32xbf16>, vector<32x128xbf16>, vector<16x128xf32> -> vector<16x128xf32>
    %c0_3 = arith.constant 0 : index
    %c0_4 = arith.constant 0 : index
    %3 = vector.load %arg3[%c0_3, %c0_4] : memref<1x128xbf16, #tpu.memory_space<vmem>>, vector<1x128xbf16>
    %4 = arith.extf %3 : vector<1x128xbf16> to vector<1x128xf32>
    %5 = vector.broadcast %4 : vector<1x128xf32> to vector<16x128xf32>
    %6 = arith.addf %2, %5 : vector<16x128xf32>
    %cst_5 = arith.constant 0.000000e+00 : f32
    %7 = vector.broadcast %cst_5 : f32 to vector<16x128xf32>
    %8 = arith.cmpf ogt, %6, %7 : vector<16x128xf32>
    %cst_6 = arith.constant 0.00999999977 : f32
    %9 = vector.broadcast %cst_6 : f32 to vector<16x128xf32>
    %10 = arith.mulf %9, %6 : vector<16x128xf32>
    %11 = arith.select %8, %6, %10 : vector<16x128xi1>, vector<16x128xf32>
    %12 = arith.truncf %11 : vector<16x128xf32> to vector<16x128xbf16>
    %c0_7 = arith.constant 0 : index
    %c0_8 = arith.constant 0 : index
    %13 = vector.load %arg4[%c0_7, %c0_8] : memref<128x128xbf16, #tpu.memory_space<vmem>>, vector<128x128xbf16>
    %cst_9 = arith.constant dense<0.000000e+00> : vector<16x128xf32>
    %14 = tpu.matmul %12, %13, %cst_9 {dimension_numbers = #tpu.dot_dimension_numbers<[1], [0], [0], [1], [0, 0, 1, 1], [], []>} : vector<16x128xbf16>, vector<128x128xbf16>, vector<16x128xf32> -> vector<16x128xf32>
    %c0_10 = arith.constant 0 : index
    %c0_11 = arith.constant 0 : index
    %15 = vector.load %arg5[%c0_10, %c0_11] : memref<1x128xbf16, #tpu.memory_space<vmem>>, vector<1x128xbf16>
    %16 = arith.extf %15 : vector<1x128xbf16> to vector<1x128xf32>
    %17 = vector.broadcast %16 : vector<1x128xf32> to vector<16x128xf32>
    %18 = arith.addf %14, %17 : vector<16x128xf32>
    %19 = arith.mulf %18, %18 : vector<16x128xf32>
    %cst_12 = arith.constant dense<0.000000e+00> : vector<16xf32>
    %20 = vector.multi_reduction <add>, %19, %cst_12 [1] : vector<16x128xf32> to vector<16xf32>
    %21 = vector.shape_cast %20 : vector<16xf32> to vector<16x1xf32>
    %cst_13 = arith.constant 1.000000e-24 : f32
    %22 = vector.broadcast %cst_13 : f32 to vector<16x1xf32>
    %23 = arith.maximumf %21, %22 : vector<16x1xf32>
    %24 = math.rsqrt %23 : vector<16x1xf32>
    %25 = vector.broadcast %24 : vector<16x1xf32> to vector<16x128xf32>
    %26 = arith.mulf %18, %25 : vector<16x128xf32>
    %27 = arith.truncf %26 : vector<16x128xf32> to vector<16x128xbf16>
    %c0_14 = arith.constant 0 : index
    %c0_15 = arith.constant 0 : index
    %28 = vector.load %arg6[%c0_14, %c0_15] : memref<16x128xbf16, #tpu.memory_space<vmem>>, vector<16x128xbf16>
    tpu.vector_store %arg6[%c0_14, %c0_15], %27 {strides = array<i32>} : memref<16x128xbf16, #tpu.memory_space<vmem>>, vector<16x128xbf16>,
    return
  }
  func.func @transform_0(%arg0: i32) -> (i32, i32) {
    %c0_i32 = arith.constant 0 : i32
    %c0_i32_0 = arith.constant 0 : i32
    return %arg0, %c0_i32 : i32, i32
  }
  func.func @transform_1(%arg0: i32) -> (i32, i32) {
    %c0_i32 = arith.constant 0 : i32
    %c0_i32_0 = arith.constant 0 : i32
    %c0_i32_1 = arith.constant 0 : i32
    return %c0_i32, %c0_i32_0 : i32, i32
  }
  func.func @transform_2(%arg0: i32) -> (i32, i32) {
    %c0_i32 = arith.constant 0 : i32
    %c0_i32_0 = arith.constant 0 : i32
    %c0_i32_1 = arith.constant 0 : i32
    return %c0_i32, %c0_i32_0 : i32, i32
  }
  func.func @transform_3(%arg0: i32) -> (i32, i32) {
    %c0_i32 = arith.constant 0 : i32
    %c0_i32_0 = arith.constant 0 : i32
    %c0_i32_1 = arith.constant 0 : i32
    return %c0_i32, %c0_i32_0 : i32, i32
  }
  func.func @transform_4(%arg0: i32) -> (i32, i32) {
    %c0_i32 = arith.constant 0 : i32
    %c0_i32_0 = arith.constant 0 : i32
    %c0_i32_1 = arith.constant 0 : i32
    return %c0_i32, %c0_i32_0 : i32, i32
  }
  func.func @transform_5(%arg0: i32) -> (i32, i32) {
    %c0_i32 = arith.constant 0 : i32
    %c0_i32_0 = arith.constant 0 : i32
    return %arg0, %c0_i32 : i32, i32
  }
}

</mosaic_0001>

<bundles_post_ra>
// kernel: tpu_custom_call.1
= control target key start
LH: loop header
LB: loop body
LE: loop exit
PB: predicated region body
PF: predicated region fallthrough
CT: control target
= control target key end

     0   :  { %10 = vsyncpa [#allocation3], 0  ;;  %s584_s0 = inlined_call_operand.hbm [shape: bf16[16,32], index: 0, kind: input, shape index: {}]   ;;  %s585_s1 = inlined_call_operand.hbm [shape: bf16[32,128], index: 1, kind: input, shape index: {}]   ;;  %s586_s2 = inlined_call_operand.vmem [shape: bf16[1,128], index: 2, kind: input, shape index: {}]   ;;  %s587_s3 = inlined_call_operand.hbm [shape: bf16[128,128], index: 3, kind: input, shape index: {}]   ;;  %s588_s4 = inlined_call_operand.vmem [shape: bf16[1,128], index: 4, kind: input, shape index: {}]   ;;  %s589_s5 = inlined_call_operand.hbm [shape: bf16[16,128], index: 5, kind: output, shape index: {}]  }
   0x1   :  { %11 = vsyncpa [#allocation6], 0 }
   0x2   :  { %12 = vsyncpa [#allocation4], 0  ;;  %s473_s18 = smov [#allocation5]   ;;  %s474_s20 = smov [#allocation2]  }
   0x3   :  { %s30_s19 = sshll.u32 %s473_s18, 4  ;;  %s18_s21 = sshll.u32 %s474_s20, 4  ;;  %s31_s19 = int_to_ptr.vmem [resolvable:$true] %s30_s19  ;;  %s511_s21 = int_to_ptr.vmem [resolvable:$true] %s18_s21 }
   0x4   :  { %s379_s24 = scalar_lea.hbm %s585_s1, 256 }
   0x5   :  { %p380_p0 = scmp.ne.s32.totalorder %s585_s1, %s379_s24  ;;  %p383_p1 = scmp.lt.u32.totalorder %s379_s24, %s585_s1 }
   0x7   :  { %p385_p2 = pnand %p383_p1, %p380_p0 }
   0x9   :  { %388 = shalt.err (!%p385_p2)
}
   0xa   :  { %s389_s29 = scalar_lea.vmem %s31_s19, 256  ;;  %p394_p4 = scmp.lt.s32.totalorder %s31_s19, %s31_s19 }
   0xb   :  { %p390_p3 = scmp.ne.s32.totalorder %s31_s19, %s389_s29  ;;  %p395_p5 = scmp.lt.s32.totalorder %s389_s29, %s389_s29 }
   0xd   :  { %p396_p6 = por %p395_p5, %p394_p4 }
   0xf   :  { %p397_p7 = pnand %p396_p6, %p390_p3 }
  0x11   :  { %400 = shalt.err (!%p397_p7)
}
  0x12   :  { %s475_s30 = smov 64   ;;  %s476_s6 = smov 4  }
  0x13   :  { %36 = dma.hbm_to_vmem [thread:$0]  %s585_s1, 256, %s31_s19, [#allocation6], %s475_s30, %s475_s30, %s476_s6  }
  0x14   :  { %s401_s11 = scalar_lea.hbm %s584_s0, 128 }
  0x15   :  { %p402_p8 = scmp.ne.s32.totalorder %s584_s0, %s401_s11  ;;  %p405_p9 = scmp.lt.u32.totalorder %s401_s11, %s584_s0 }
  0x17   :  { %p407_p10 = pnand %p405_p9, %p402_p8 }
  0x19   :  { %410 = shalt.err (!%p407_p10)
}
  0x1a   :  { %s411_s16 = scalar_lea.vmem %s511_s21, 128  ;;  %p416_p12 = scmp.lt.s32.totalorder %s511_s21, %s511_s21 }
  0x1b   :  { %p412_p11 = scmp.ne.s32.totalorder %s511_s21, %s411_s16  ;;  %p417_p13 = scmp.lt.s32.totalorder %s411_s16, %s411_s16 }
  0x1d   :  { %p418_p0 = por %p417_p13, %p416_p12 }
  0x1f   :  { %p419_p1 = pnand %p418_p0, %p412_p11 }
  0x21   :  { %422 = shalt.err (!%p419_p1)
}
  0x22   :  { %24 = dma.hbm_to_vmem [thread:$0]  %s584_s0, 128, %s511_s21, [#allocation3], %s475_s30, %s475_s30, %s476_s6  }
  0x23   :  { %s477_s18 = smov [#allocation7]   ;;  %s423_s23 = scalar_lea.hbm %s587_s3, 1024 }
  0x24   :  { %s44_s19 = sshll.u32 %s477_s18, 4  ;;  %p424_p2 = scmp.ne.s32.totalorder %s587_s3, %s423_s23  ;;  %s45_s19 = int_to_ptr.vmem [resolvable:$true] %s44_s19 }
  0x25   :  { %p427_p3 = scmp.lt.u32.totalorder %s423_s23, %s587_s3 }
  0x27   :  { %p429_p4 = pnand %p427_p3, %p424_p2 }
  0x29   :  { %432 = shalt.err (!%p429_p4)
}
  0x2a   :  { %s433_s28 = scalar_lea.vmem %s45_s19, 1024  ;;  %p438_p6 = scmp.lt.s32.totalorder %s45_s19, %s45_s19 }
  0x2b   :  { %p434_p5 = scmp.ne.s32.totalorder %s45_s19, %s433_s28  ;;  %p439_p7 = scmp.lt.s32.totalorder %s433_s28, %s433_s28 }
  0x2d   :  { %p440_p8 = por %p439_p7, %p438_p6 }
  0x2f   :  { %p441_p9 = pnand %p440_p8, %p434_p5 }
  0x31   :  { %444 = shalt.err (!%p441_p9)
}
  0x32   :  { %50 = dma.hbm_to_vmem [thread:$0]  %s587_s3, 1024, %s45_s19, [#allocation6], %s475_s30, %s475_s30, %s476_s6  }
  0x33   :  { %467 = dma.done.wait [#allocation3], 128  }
  0x34   :  { %468 = vsyncadd [#allocation3], 4294967168 }
  0x35   :  { %469 = dma.done.wait [#allocation6], 1280  }
  0x36   :  { %470 = vsyncadd [#allocation6], 4294966016  ;;  %v478_v0 = vmov 0.0   ;;  %vm479_vm0 = vmmov 0   ;;  %v364_v1 = vld [vmem:[#allocation5] sm:$0xff]   ;;  %v365_v2 = vld [vmem:[#allocation5 + $0x8] sm:$0xff]   ;;  %v71_v12 = vlaneseq }
  0x37   :  { %328 = vmatprep.subr.bf16.mxu0 %v478_v0  ;;  %332 = vmatprep.mubr.msk.bf16.mxu0 %vm479_vm0, %v478_v0  ;;  %v367_v3 = vld [vmem:[#allocation7] sm:$0xff]   ;;  %v366_v4 = vld [vmem:[#allocation2] sm:$0xff]   ;;  %vm92_vm1 = vcmask 261120   ;;  %v369_v6 = vld [vmem:[#allocation7 + $0x10] sm:$0xff]  }
  0x38   :  { %336 = vmatprep.subr.bf16.mxu1 %v478_v0  ;;  %352 = vmatprep.mubr.msk.bf16.mxu1 %vm479_vm0, %v478_v0  ;;  %v368_v5 = vld [vmem:[#allocation7 + $0x8] sm:$0xff]   ;;  %v370_v7 = vld [vmem:[#allocation7 + $0x18] sm:$0xff]   ;;  %v371_v8 = vld [vmem:[#allocation7 + $0x20] sm:$0xff]   ;;  %v72_v13 = vshrl.u32 %v71_v12, 7 }
  0x39   :  { %329 = vmatpush3.bf16.msra.mxu0 %v364_v1  ;;  %337 = vmatpush3.bf16.msra.mxu1 %v367_v3  ;;  %v372_v9 = vld [vmem:[#allocation7 + $0x28] sm:$0xff]   ;;  %v373_v10 = vld [vmem:[#allocation7 + $0x30] sm:$0xff]   ;;  %v374_v11 = vld [vmem:[#allocation7 + $0x38] sm:$0xff]  }
  0x3a   :  { %330 = vmatprep.subr.bf16.mxu0 %v478_v0  ;;  %338 = vmatprep.subr.bf16.mxu1 %v478_v0  ;;  %v69_v14 = vld [vmem:[%s586_s2] sm:$0x1]  ;;  %v73_v16 = vsub.s32 0, %v72_v13  ;;  %s480_s2 = smov [#allocation8]  }
  0x3b   :  { %v70_v15 = vunpack.c.l.bf16 %v69_v14  ;;  %v160_v29 = vld [vmem:[%s588_s4] sm:$0x1]  ;;  %s282_s4 = sshll.u32 %s480_s2, 4  ;;  %s283_s4 = int_to_ptr.vmem [resolvable:$true] %s282_s4 }
  0x3c   :  { %v161_v30 = vunpack.c.l.bf16 %v160_v29  ;;  %s445_s9 = scalar_lea.vmem %s283_s4, 128  ;;  %p450_p11 = scmp.lt.s32.totalorder %s283_s4, %s283_s4 }
  0x3d   :  { %331 = vmatpush3.bf16.msra.mxu0 %v365_v2  ;;  %339 = vmatpush3.bf16.msra.mxu1 %v368_v5  ;;  %v74_v17 = vrot.slane %v70_v15, %v73_v16  ;;  %p446_p10 = scmp.ne.s32.totalorder %s283_s4, %s445_s9  ;;  %p451_p12 = scmp.lt.s32.totalorder %s445_s9, %s445_s9 }
  0x3e   :  { %340 = vmatprep.subr.bf16.mxu1 %v478_v0  ;;  %v165_v31 = vrot.slane %v161_v30, %v73_v16 }
  0x3f   :  { %p452_p13 = por %p451_p12, %p450_p11 }
  0x40   :  { %333 = vmatmul.mubr.msk.bf16.vlgmr.msra.gmra.mrb[0].mxu0 %vm92_vm1, %v366_v4 }
  0x41   :  { %341 = vmatpush3.bf16.msra.mxu1 %v369_v6  ;;  %p453_p0 = pnand %p452_p13, %p446_p10 }
  0x42   :  { %342 = vmatprep.subr.bf16.mxu1 %v478_v0 }
  0x45   :  { %343 = vmatpush3.bf16.msra.mxu1 %v370_v7 }
  0x46   :  { %344 = vmatprep.subr.bf16.mxu1 %v478_v0 }
  0x49   :  { %345 = vmatpush3.bf16.msra.mxu1 %v371_v8 }
  0x4a   :  { %346 = vmatprep.subr.bf16.mxu1 %v478_v0 }
  0x4d   :  { %347 = vmatpush3.bf16.msra.mxu1 %v372_v9 }
  0x4e   :  { %348 = vmatprep.subr.bf16.mxu1 %v478_v0 }
  0x51   :  { %349 = vmatpush3.bf16.msra.mxu1 %v373_v10 }
  0x52   :  { %350 = vmatprep.subr.bf16.mxu1 %v478_v0 }
  0x55   :  { %351 = vmatpush3.bf16.msra.mxu1 %v374_v11 }
 0x113   :  { %v130_v18 = vpop.f32.mrb[0].mxu0 }
 0x114   :  { %v131_v19 = vadd.f32 %v130_v18, %v74_v17  ;;  %v334_v20 = vpop.f32.mrb[1].mxu0 }
 0x115   :  { %v133_v21 = vpop.f32.mrb[2].mxu0 }
 0x116   :  { %v139_v22 = vmul.f32 0.01, %v131_v19  ;;  %v134_v23 = vadd.f32 %v133_v21, %v74_v17  ;;  %v335_v24 = vpop.f32.mrb[3].mxu0  ;;  %vm137_vm2 = vcmp.gt.f32.partialorder %v131_v19, 0.0 }
 0x118   :  { %vm138_vm3 = vcmp.gt.f32.partialorder %v134_v23, 0.0  ;;  %v140_v25 = vmul.f32 0.01, %v134_v23  ;;  %v141_v26 = vsel %vm137_vm2, %v131_v19, %v139_v22 }
 0x11a   :  { %v142_v27 = vsel %vm138_vm3, %v134_v23, %v140_v25 }
 0x11b   :  { %v143_v28 = vpack.c.bf16 %v142_v27, %v141_v26 }
 0x11d   :  { %353 = vmatmul.mubr.bf16.vlgmr.msra.gmra.mrb[0].mxu1 %v143_v28 }
 0x1f0   :  { %v248_v32 = vpop.f32.mrb[0].mxu1 }
 0x1f1   :  { %v249_v33 = vadd.f32 %v248_v32, %v165_v31  ;;  %v354_v34 = vpop.f32.mrb[1].mxu1 }
 0x1f2   :  { %v251_v35 = vpop.f32.mrb[2].mxu1 }
 0x1f3   :  { %v252_v36 = vadd.f32 %v251_v35, %v165_v31  ;;  %v355_v37 = vpop.f32.mrb[3].mxu1  ;;  %v255_v38 = vmul.f32 %v249_v33, %v249_v33 }
 0x1f5   :  { %257 = vadd.xlane.f32.xlu0 %v255_v38  ;;  %v256_v39 = vmul.f32 %v252_v36, %v252_v36 }
 0x1f9   :  { %259 = vadd.xlane.f32.xlu0 %v256_v39 }
 0x282   :  { %v258_v40 = vpop.xlane.xlu0 %257 }
 0x283   :  { %v261_v41 = vmax.f32 %v258_v40, 1e-24 }
 0x285   :  { %375 = vrsqrt.f32 %v261_v41 }
 0x286   :  { %v260_v42 = vpop.xlane.xlu0 %259 }
 0x287   :  { %v262_v43 = vmax.f32 %v260_v42, 1e-24 }
 0x289   :  { %377 = vrsqrt.f32 %v262_v43 }
 0x28f   :  { %v376_v44 = vpop.eup %375 }
 0x290   :  { %v265_v46 = vmul.f32 %v376_v44, %v249_v33 }
 0x293   :  { %v378_v45 = vpop.eup %377 }
 0x294   :  { %v266_v47 = vmul.f32 %v378_v45, %v252_v36 }
 0x296   :  { %v314_v48 = vpack.c.bf16 %v266_v47, %v265_v46 }
 0x298   :  { %315 = vst [vmem:[#allocation8] sm:$0xff] %v314_v48  }
 0x299   :  { %456 = shalt.err (!%p453_p0)
}
 0x29a   :  { %s457_s12 = scalar_lea.hbm %s589_s5, 128 }
 0x29b   :  { %p458_p1 = scmp.ne.s32.totalorder %s589_s5, %s457_s12  ;;  %p461_p2 = scmp.lt.u32.totalorder %s457_s12, %s589_s5 }
 0x29d   :  { %p463_p3 = pnand %p461_p2, %p458_p1 }
 0x29f   :  { %466 = shalt.err (!%p463_p3)
}
 0x2a0   :  { %288 = dma.vmem_to_hbm [thread:$0]  %s283_s4, 128, %s589_s5, [#allocation4], %s475_s30, %s475_s30, %s476_s6  }
 0x2a1   :  { %471 = dma.done.wait [#allocation4], 128  }
 0x2a2   :  { %472 = vsyncadd [#allocation4], 4294967168 }
 0x2a3   :  { %292 = vsyncpa [#allocation3], 1 }
 0x2a4   :  { %293 = vsyncpa [#allocation6], 1 }
 0x2a5   :  { %294 = vsyncpa [#allocation4], 1 }

</bundles_post_ra>
